<compile_context>
chip_gen: v6e
topology: v6e:2x2x1
jax: 0.10.0
libtpu: 0.0.40
codegen_flags: <defaults>
</compile_context>

<pallas_src>
import functools

import jax
import jax.numpy as jnp
from jax import lax
from jax.experimental import pallas as pl
from jax.experimental.pallas import tpu as pltpu


def _cdiv(a, b):
    return -(-a // b)


def _round_up(x, m):
    return ((x + m - 1) // m) * m


def _vmem_capacity_bytes(default=64 * 1024 * 1024):
    """Per-TensorCore VMEM capacity; conservative 64 MiB fallback (covers v7x)."""
    try:
        info = pltpu.get_tpu_info()
        for name in ("vmem_capacity_bytes", "vmem_size_bytes", "vmem_bytes"):
            val = getattr(info, name, None)
            if val:
                return int(val)
    except Exception:
        pass
    return int(default)


def _tensorcores_per_device():
    """2 on megacore / multi-TC parts (v4, v5p, v7x), else 1 (v5e, v6e)."""
    try:
        kind = jax.devices()[0].device_kind.lower()
    except Exception:
        return 1
    if "lite" in kind:
        return 1
    for tag in ("v4", "v5p", "v7", "7x"):
        if tag in kind:
            return 2
    return 1


def _focal_loss_kernel(logits_ref, targets_ref, out_ref, acc_ref, *, gamma):
    tile = pl.program_id(1)  # inner "arbitrary" (reduction) axis over row tiles

    @pl.when(tile == 0)
    def _init():
        acc_ref[...] = jnp.zeros_like(acc_ref)

    x = logits_ref[...]                         # (TM, C) native dtype (f32 or bf16)
    m, c = x.shape
    tgt = targets_ref[...]                      # (TM, 1) int32; padding/ignored rows = -1

    # Numerically stable per-row cross entropy, no explicit one-hot.
    # Max in the native dtype is exact; the subtract happens in f32.
    row_max = jnp.max(x, axis=-1, keepdims=True)
    shifted = x.astype(jnp.float32) - row_max.astype(jnp.float32)     # (TM, C) f32
    sumexp = jnp.sum(jnp.exp(shifted), axis=-1, keepdims=True)        # (TM, 1)
    col_ids = lax.broadcasted_iota(jnp.int32, (m, c), 1)
    picked = jnp.sum(jnp.where(col_ids == tgt, shifted, 0.0),
                     axis=-1, keepdims=True)                          # (TM, 1)

    # ---- Lane-sparse (TM,1) tail: keep the op count minimal ----
    lse = jnp.log(sumexp)
    bce = lse - picked                       # per-row cross entropy
    pt = jnp.exp(picked - lse)               # = exp(-bce)
    omp = 1.0 - pt
    gi = int(gamma)
    if float(gamma) == float(gi) and gi >= 0:
        # Integer-gamma fast path: plain multiplies (no pow -> log/exp, no 0*log(0)).
        w = None
        for _ in range(gi):
            w = omp if w is None else w * omp
        focal = bce if w is None else w * bce
    else:
        # Clamp away from 0 to avoid NaN from pow when pt numerically exceeds 1.
        focal = jnp.maximum(omp, jnp.float32(1e-30)) ** jnp.float32(gamma) * bce

    # Rows with target < 0 (batch padding or ignore_index-style) contribute zero.
    # Per-tile accumulation is a single VPU add into VMEM (no per-tile full reduce).
    acc_ref[...] += jnp.where(tgt >= 0, focal, 0.0)

    @pl.when(tile == pl.num_programs(1) - 1)
    def _flush():
        # One cross-sublane reduce per split; lane-dense 128-wide output block.
        out_ref[...] = jnp.full((1, 128), jnp.sum(acc_ref[...]), dtype=jnp.float32)


def focal_loss(logits, targets, alpha=1.0, gamma=2.0, reduction="mean",
               *, block_rows=None, num_splits=None):
    """logits: (N, C) float (f32 or bf16); targets: (N,) int class indices.

    Targets outside [0, C) (e.g. -100) contribute zero, like ignore_index.
    Returns a scalar f32 ('mean' or 'sum').
    """
    if reduction not in ("mean", "sum"):
        # TODO(synk): reduction='none' (per-sample vector output) not implemented.
        raise NotImplementedError("reduction must be 'mean' or 'sum'")

    n, c = logits.shape
    itemsize = jnp.dtype(logits.dtype).itemsize
    sub = 8 * max(1, 4 // itemsize)          # 8 rows f32, 16 bf16, 32 int8

    if num_splits is None:
        num_splits = _tensorcores_per_device()
    num_splits = max(1, int(num_splits))

    # ---- Tile sizing from C / dtype / generation-aware VMEM budget ----
    vmem_cap = _vmem_capacity_bytes()
    vmem_limit = max(32 * 1024 * 1024, (vmem_cap * 3) // 4)   # 48 MiB v7x, 96 MiB v5e/v6e
    c_pad = _round_up(c, 128)
    # Per-row VMEM: double-buffered logits + width-1 target stream (lane-padded),
    # ~3 live full-width f32 intermediates, a few lane-sparse temps + accumulator.
    row_vmem = 2 * (c_pad * itemsize + 512) + 3 * c_pad * 4 + 4 * 512
    tm_fit = max(sub, (((vmem_limit // 2) // row_vmem) // sub) * sub)

    target_tile_bytes = 4 * 1024 * 1024      # past the ~0.35us/step overhead knee
    tm = max(sub, target_tile_bytes // max(c * itemsize, 1))
    tm = min(tm, tm_fit, 4096)
    if num_splits > 1:
        # Give every TensorCore at least one tile of real rows.
        tm = min(tm, _round_up(_cdiv(n, num_splits), sub))
    tm = min(tm, _round_up(n, sub))
    if block_rows is not None:
        tm = min(tm, max(sub, int(block_rows)))
    tm = max(sub, (tm // sub) * sub)

    n_tiles = _cdiv(n, tm)
    tiles_per_split = _cdiv(n_tiles, num_splits)
    n_padded = tm * tiles_per_split * num_splits

    # Sanitize targets: out-of-range (incl. -100 ignore_index) -> -1 -> contributes 0.
    t = targets.astype(jnp.int32)
    t = jnp.where((t >= 0) & (t < c), t, -1).reshape(n, 1)

    if n_padded != n:
        logits = jnp.pad(logits, ((0, n_padded - n), (0, 0)))
        t = jnp.pad(t, ((0, n_padded - n), (0, 0)), constant_values=-1)

    kernel = functools.partial(_focal_loss_kernel, gamma=float(gamma))

    out = pl.pallas_call(
        kernel,
        out_shape=jax.ShapeDtypeStruct((1, 128 * num_splits), jnp.float32),
        grid_spec=pltpu.PrefetchScalarGridSpec(
            num_scalar_prefetch=0,
            grid=(num_splits, tiles_per_split),
            in_specs=[
                pl.BlockSpec((tm, c), lambda i, j: (i * tiles_per_split + j, 0)),
                pl.BlockSpec((tm, 1), lambda i, j: (i * tiles_per_split + j, 0)),
            ],
            out_specs=pl.BlockSpec((1, 128), lambda i, j: (0, i)),
            scratch_shapes=[pltpu.VMEM((tm, 1), jnp.float32)],
        ),
        compiler_params=pltpu.CompilerParams(
            dimension_semantics=("parallel", "arbitrary"),
            vmem_limit_bytes=int(vmem_limit),
        ),
    )(logits, t)

    total = jnp.float32(alpha) * jnp.sum(out[0, ::128])   # lane 0 of each split block
    if reduction == "sum":
        return total
    return total / jnp.float32(n)


def _focal_loss_ref(logits, targets, alpha=1.0, gamma=2.0):
    logits = logits.astype(jnp.float32)
    _, c = logits.shape
    t = targets.astype(jnp.int32)
    valid = (t >= 0) & (t < c)
    safe_t = jnp.where(valid, t, 0)
    logp = jax.nn.log_softmax(logits, axis=-1)
    bce = -jnp.take_along_axis(logp, safe_t[:, None], axis=-1)[:, 0]
    bce = jnp.where(valid, bce, 0.0)
    pt = jnp.exp(-bce)
    return jnp.mean(alpha * (1.0 - pt) ** gamma * bce)


if __name__ == "__main__":
    key = jax.random.PRNGKey(0)
    k1, k2, k3, k4 = jax.random.split(key, 4)

    # Small case: batch=8, classes=32.
    N, C = 8, 32
    logits = jax.random.normal(k1, (N, C), dtype=jnp.float32)
    targets = jax.random.randint(k2, (N,), 0, C, dtype=jnp.int32)
    loss = jax.block_until_ready(focal_loss(logits, targets, alpha=1.0, gamma=2.0))
    ref = _focal_loss_ref(logits, targets, 1.0, 2.0)
    assert jnp.allclose(loss, ref, rtol=1e-5, atol=1e-6), (loss, ref)

    # bf16 logits path (max in bf16 is exact; rest of the math in f32).
    logits_bf16 = logits.astype(jnp.bfloat16)
    loss_bf16 = jax.block_until_ready(focal_loss(logits_bf16, targets))
    ref_bf16 = _focal_loss_ref(logits_bf16.astype(jnp.float32), targets)
    assert jnp.allclose(loss_bf16, ref_bf16, rtol=1e-5, atol=1e-6), (loss_bf16, ref_bf16)

    # Larger ragged case: multi-tile accumulation, batch padding, split axis,
    # and two ignore_index-style (-100) targets that must contribute zero.
    N2, C2 = 1037, 384
    logits2 = jax.random.normal(k3, (N2, C2), dtype=jnp.float32)
    targets2 = jax.random.randint(k4, (N2,), 0, C2, dtype=jnp.int32)
    targets2 = targets2.at[5].set(-100).at[700].set(-100)
    loss2 = jax.block_until_ready(
        focal_loss(logits2, targets2, alpha=0.5, gamma=2.0, block_rows=256))
    ref2 = _focal_loss_ref(logits2, targets2, 0.5, 2.0)
    assert jnp.allclose(loss2, ref2, rtol=1e-4, atol=1e-5), (loss2, ref2)

    # 'sum' reduction.
    loss_sum = jax.block_until_ready(
        focal_loss(logits2, targets2, alpha=0.5, gamma=2.0, reduction="sum"))
    assert jnp.allclose(loss_sum, ref2 * N2, rtol=1e-4, atol=1e-4), (loss_sum, ref2 * N2)

    print("KERNEL_OK")
</pallas_src>

<mosaic_0001>
module attributes {stable_mosaic.version = 11 : i64} {
  func.func @_focal_loss_kernel(%arg0: i32, %arg1: i32, %arg2: memref<8x32xf32, #tpu.memory_space<vmem>>, %arg3: memref<8x1xi32, #tpu.memory_space<vmem>>, %arg4: memref<1x128xf32, #tpu.memory_space<vmem>>, %arg5: memref<8x1xf32, #tpu.memory_space<vmem>>) attributes {dimension_semantics = [#tpu.dimension_semantics<parallel>, #tpu.dimension_semantics<arbitrary>], iteration_bounds = array<i64: 1, 1>, scalar_prefetch = 0 : i64, scratch_operands = 1 : i64, tpu.core_type = #tpu.core_type<tc>, window_params = [{transform_indices = @transform_0, window_bounds = array<i64: 8, 32>}, {transform_indices = @transform_1, window_bounds = array<i64: 8, 1>}, {transform_indices = @transform_2, window_bounds = array<i64: 1, 128>}]} {
    %c0_i32 = arith.constant 0 : i32
    %0 = arith.cmpi eq, %arg1, %c0_i32 : i32
    %1 = arith.extui %0 : i1 to i32
    %c0_i32_0 = arith.constant 0 : i32
    %2 = arith.cmpi ne, %1, %c0_i32_0 : i32
    scf.if %2 {
      %cst_16 = arith.constant 0.000000e+00 : f32
      %37 = vector.broadcast %cst_16 : f32 to vector<8x1xf32>
      %c0_17 = arith.constant 0 : index
      %c0_18 = arith.constant 0 : index
      %38 = vector.load %arg5[%c0_17, %c0_18] : memref<8x1xf32, #tpu.memory_space<vmem>>, vector<8x1xf32>
      tpu.vector_store %arg5[%c0_17, %c0_18], %37 {strides = array<i32>} : memref<8x1xf32, #tpu.memory_space<vmem>>, vector<8x1xf32>,
    } else {
    }
    %c0 = arith.constant 0 : index
    %c0_1 = arith.constant 0 : index
    %3 = vector.load %arg2[%c0, %c0_1] : memref<8x32xf32, #tpu.memory_space<vmem>>, vector<8x32xf32>
    %c0_2 = arith.constant 0 : index
    %c0_3 = arith.constant 0 : index
    %4 = vector.load %arg3[%c0_2, %c0_3] : memref<8x1xi32, #tpu.memory_space<vmem>>, vector<8x1xi32>
    %cst = arith.constant dense<0xFF800000> : vector<8xf32>
    %5 = vector.multi_reduction <maximumf>, %3, %cst [1] : vector<8x32xf32> to vector<8xf32>
    %6 = vector.shape_cast %5 : vector<8xf32> to vector<8x1xf32>
    %7 = vector.broadcast %6 : vector<8x1xf32> to vector<8x32xf32>
    %8 = arith.subf %3, %7 : vector<8x32xf32>
    %9 = math.exp %8 : vector<8x32xf32>
    %cst_4 = arith.constant dense<0.000000e+00> : vector<8xf32>
    %10 = vector.multi_reduction <add>, %9, %cst_4 [1] : vector<8x32xf32> to vector<8xf32>
    %11 = vector.shape_cast %10 : vector<8xf32> to vector<8x1xf32>
    %12 = tpu.iota {dimensions = array<i32: 1>} : vector<8x32xi32>
    %13 = vector.broadcast %4 : vector<8x1xi32> to vector<8x32xi32>
    %14 = arith.cmpi eq, %12, %13 : vector<8x32xi32>
    %cst_5 = arith.constant 0.000000e+00 : f32
    %15 = vector.broadcast %cst_5 : f32 to vector<8x32xf32>
    %16 = arith.select %14, %8, %15 : vector<8x32xi1>, vector<8x32xf32>
    %cst_6 = arith.constant dense<0.000000e+00> : vector<8xf32>
    %17 = vector.multi_reduction <add>, %16, %cst_6 [1] : vector<8x32xf32> to vector<8xf32>
    %18 = vector.shape_cast %17 : vector<8xf32> to vector<8x1xf32>
    %19 = math.log %11 : vector<8x1xf32>
    %20 = arith.subf %19, %18 : vector<8x1xf32>
    %21 = arith.subf %18, %19 : vector<8x1xf32>
    %22 = math.exp %21 : vector<8x1xf32>
    %cst_7 = arith.constant 1.000000e+00 : f32
    %23 = vector.broadcast %cst_7 : f32 to vector<8x1xf32>
    %24 = arith.subf %23, %22 : vector<8x1xf32>
    %25 = arith.mulf %24, %24 : vector<8x1xf32>
    %26 = arith.mulf %25, %20 : vector<8x1xf32>
    %c0_8 = arith.constant 0 : index
    %c0_9 = arith.constant 0 : index
    %27 = vector.load %arg5[%c0_8, %c0_9] : memref<8x1xf32, #tpu.memory_space<vmem>>, vector<8x1xf32>
    %c0_i32_10 = arith.constant 0 : i32
    %28 = vector.broadcast %c0_i32_10 : i32 to vector<8x1xi32>
    %29 = arith.cmpi sge, %4, %28 : vector<8x1xi32>
    %cst_11 = arith.constant 0.000000e+00 : f32
    %30 = vector.broadcast %cst_11 : f32 to vector<8x1xf32>
    %31 = arith.select %29, %26, %30 : vector<8x1xi1>, vector<8x1xf32>
    %32 = arith.addf %27, %31 : vector<8x1xf32>
    %c0_12 = arith.constant 0 : index
    %c0_13 = arith.constant 0 : index
    %33 = vector.load %arg5[%c0_12, %c0_13] : memref<8x1xf32, #tpu.memory_space<vmem>>, vector<8x1xf32>
    tpu.vector_store %arg5[%c0_12, %c0_13], %32 {strides = array<i32>} : memref<8x1xf32, #tpu.memory_space<vmem>>, vector<8x1xf32>,
    %c0_i32_14 = arith.constant 0 : i32
    %34 = arith.cmpi eq, %arg1, %c0_i32_14 : i32
    %35 = arith.extui %34 : i1 to i32
    %c0_i32_15 = arith.constant 0 : i32
    %36 = arith.cmpi ne, %35, %c0_i32_15 : i32
    scf.if %36 {
      %c0_16 = arith.constant 0 : index
      %c0_17 = arith.constant 0 : index
      %37 = vector.load %arg5[%c0_16, %c0_17] : memref<8x1xf32, #tpu.memory_space<vmem>>, vector<8x1xf32>
      %38 = vector.shape_cast %37 : vector<8x1xf32> to vector<1x8x1xf32>
      %cst_18 = arith.constant dense<0.000000e+00> : vector<1xf32>
      %39 = vector.multi_reduction <add>, %38, %cst_18 [1, 2] : vector<1x8x1xf32> to vector<1xf32>
      %40 = vector.shape_cast %39 : vector<1xf32> to vector<1x1x1xf32>
      %41 = vector.extract %40[0, 0, 0] : f32 from vector<1x1x1xf32>
      %42 = vector.broadcast %41 : f32 to vector<1x128xf32>
      %c0_19 = arith.constant 0 : index
      %c0_20 = arith.constant 0 : index
      %43 = vector.load %arg4[%c0_19, %c0_20] : memref<1x128xf32, #tpu.memory_space<vmem>>, vector<1x128xf32>
      tpu.vector_store %arg4[%c0_19, %c0_20], %42 {strides = array<i32>} : memref<1x128xf32, #tpu.memory_space<vmem>>, vector<1x128xf32>,
    } else {
    }
    return
  }
  func.func @transform_0(%arg0: i32, %arg1: i32) -> (i32, i32) {
    %c1_i32 = arith.constant 1 : i32
    %0 = arith.muli %arg0, %c1_i32 : i32
    %1 = arith.addi %0, %arg1 : i32
    %c0_i32 = arith.constant 0 : i32
    %c0_i32_0 = arith.constant 0 : i32
    return %1, %c0_i32 : i32, i32
  }
  func.func @transform_1(%arg0: i32, %arg1: i32) -> (i32, i32) {
    %c1_i32 = arith.constant 1 : i32
    %0 = arith.muli %arg0, %c1_i32 : i32
    %1 = arith.addi %0, %arg1 : i32
    %c0_i32 = arith.constant 0 : i32
    %c0_i32_0 = arith.constant 0 : i32
    return %1, %c0_i32 : i32, i32
  }
  func.func @transform_2(%arg0: i32, %arg1: i32) -> (i32, i32) {
    %c0_i32 = arith.constant 0 : i32
    %c0_i32_0 = arith.constant 0 : i32
    return %c0_i32, %arg0 : i32, i32
  }
}

</mosaic_0001>

<bundles_post_ra>
// kernel: tpu_custom_call.1
= control target key start
LH: loop header
LB: loop body
LE: loop exit
PB: predicated region body
PF: predicated region fallthrough
CT: control target
= control target key end

     0   :  { %vm54_vm0 = vcmask 261120   ;;  %s198_s0 = inlined_call_operand.vmem [shape: f32[8,32], index: 0, kind: input, shape index: {}]   ;;  %s199_s1 = inlined_call_operand.vmem [shape: s32[8,1], index: 1, kind: input, shape index: {}]   ;;  %s200_s2 = inlined_call_operand.hbm [shape: f32[1,128], index: 2, kind: output, shape index: {}]  }
   0x1   :  { %v52_v0 = vld [vmem:[%s198_s0] sm:$0xff] }
   0x2   :  { %7 = vsyncpa [#allocation4], 0  ;;  %v55_v1 = vsel %vm54_vm0, %v52_v0, -inf  ;;  %v165_v2 = vmov 0   ;;  %v53_v3 = vld [vmem:[%s199_s1] sm:$0xff]  ;;  %v64_v7 = vlaneseq  ;;  %vm50_vm2 = vcmask 7168  }
   0x3   :  { %136 = vset.pattern.permute.xlu0 %v165_v2  ;;  %v166_v14 = vmov 0.0   ;;  %vm84_vm3 = vcmp.ge.s32.totalorder %v53_v3, 0  ;;  %s167_s0 = smov [#allocation3]  }
   0x4   :  { %56 = vmax.xlane.f32.xlu0 %v55_v1  ;;  %v65_v8 = vand.u32 127, %v64_v7  ;;  %51 = vst.msk [vmem:[#allocation2] sm:$0xff] %vm50_vm2, %v166_v14  ;;  %s111_s1 = sshll.u32 %s167_s0, 4  ;;  %s112_s1 = int_to_ptr.vmem [resolvable:$true] %s111_s1 }
   0x5   :  { %s143_s14 = scalar_lea.vmem %s112_s1, 16  ;;  %s147_s15 = scalar_lea.vmem %s112_s1, 32 }
   0x6   :  { %p144_p0 = scmp.ne.s32.totalorder %s112_s1, %s143_s14  ;;  %p148_p1 = scmp.lt.s32.totalorder %s112_s1, %s112_s1 }
   0x7   :  { %p149_p2 = scmp.lt.s32.totalorder %s147_s15, %s143_s14 }
   0x9   :  { %p150_p3 = por %p149_p2, %p148_p1 }
   0xb   :  { %v83_v26 = vld [vmem:[#allocation2] sm:$0xff]  ;;  %p151_p4 = pnand %p150_p3, %p144_p0 }
  0x1a   :  { %67 = vperm.xlu0 %136, %v53_v3  }
  0x8d   :  { %v57_v4 = vpop.xlane.xlu0 %56 }
  0x8e   :  { %v58_v5 = vsub.f32 %v52_v0, %v57_v4 }
  0x90   :  { %v59_v6 = vmul.f32 1.442695, %v58_v5 }
  0x92   :  { %137 = vpow2.f32 %v59_v6 }
  0x95   :  { %v68_v9 = vpop.permute.xlu0 %67 }
  0x96   :  { %vm69_vm1 = vcmp.eq.s32.totalorder %v65_v8, %v68_v9 }
  0x97   :  { %v70_v12 = vsel %vm69_vm1, %v58_v5, 0.0 }
  0x98   :  { %v71_v13 = vsel %vm54_vm0, %v70_v12, 0.0 }
  0x9f   :  { %v138_v10 = vpop.eup %137 }
  0xa0   :  { %v61_v11 = vsel %vm54_vm0, %v138_v10, 0.0 }
  0xa1   :  { %62 = vadd.xlane.f32.xlu1 %v61_v11 }
  0xa5   :  { %72 = vadd.xlane.f32.xlu1 %v71_v13 }
 0x12a   :  { %v63_v15 = vpop.xlane.xlu1 %62 }
 0x12b   :  { %139 = vlog2.f32 %v63_v15 }
 0x12e   :  { %v73_v18 = vpop.xlane.xlu1 %72 }
 0x138   :  { %v140_v16 = vpop.eup %139 }
 0x139   :  { %v75_v17 = vmul.f32 0.6931472, %v140_v16 }
 0x13b   :  { %v77_v19 = vsub.f32 %v73_v18, %v75_v17  ;;  %v76_v23 = vsub.f32 %v75_v17, %v73_v18 }
 0x13d   :  { %v78_v20 = vmul.f32 1.442695, %v77_v19 }
 0x13f   :  { %141 = vpow2.f32 %v78_v20 }
 0x14c   :  { %v142_v21 = vpop.eup %141 }
 0x14d   :  { %v80_v22 = vsub.f32 1.0, %v142_v21 }
 0x14f   :  { %v81_v24 = vmul.f32 %v80_v22, %v80_v22 }
 0x151   :  { %v82_v25 = vmul.f32 %v81_v24, %v76_v23 }
 0x153   :  { %v85_v27 = vsel %vm84_vm3, %v82_v25, 0.0 }
 0x154   :  { %v86_v28 = vadd.f32 %v85_v27, %v83_v26 }
 0x156   :  { %88 = vst.msk [vmem:[#allocation2] sm:$0xff] %vm50_vm2, %v86_v28 }
 0x15d   :  { %v92_v29 = vld [vmem:[#allocation2] sm:$0xff] }
 0x15e   :  { %v93_v30 = vsel %vm50_vm2, %v92_v29, 0.0 }
 0x15f   :  { %94 = vadd.xlane.f32.xlu1 %v93_v30 }
 0x1e8   :  { %v95_v31 = vpop.xlane.xlu1 %94 }
 0x1e9   :  { %v96_v32 = vrot.slane %v95_v31, 4 }
 0x1eb   :  { %v97_v33 = vadd.f32 %v96_v32, %v95_v31 }
 0x1ed   :  { %v98_v34 = vrot.slane %v97_v33, 2 }
 0x1ef   :  { %v99_v35 = vadd.f32 %v98_v34, %v97_v33 }
 0x1f1   :  { %v100_v36 = vrot.slane %v99_v35, 1 }
 0x1f3   :  { %v101_v37 = vadd.f32 %v100_v36, %v99_v35 }
 0x1f5   :  { %131 = vpush %v101_v37 }
 0x226   :  { %s132_s13 = spop %131 }
 0x227   :  { %v103_v38 = vstv %s132_s13 }
 0x228   :  { %104 = vst [vmem:[#allocation3] sm:$0x1] %v103_v38 }
 0x229   :  { %154 = shalt.err (!%p151_p4)
}
 0x22a   :  { %114 = dma.vmem_to_hbm [thread:$0]  %s112_s1, 16, %s200_s2, [#allocation4]  }
 0x22b   :  { %163 = dma.done.wait [#allocation4], 16  }
 0x22c   :  { %164 = vsyncadd [#allocation4], 4294967280 }
 0x22d   :  { %118 = vsyncpa [#allocation4], 1 }

</bundles_post_ra>
